<compile_context>
chip_gen: v7x
topology: tpu7x:2x2x1
jax: 0.10.0
libtpu: 0.0.40
codegen_flags: <defaults>
</compile_context>

<pallas_src>
import functools

import jax
import jax.numpy as jnp
from jax.experimental import pallas as pl
from jax.experimental.pallas import tpu as pltpu


# ---------------------------------------------------------------------------
# Fused Pallas kernel: one batch element, all 4 views, both conv+BN+ReLU layers.
# ---------------------------------------------------------------------------
def _fused_multiview_kernel(W, x_ref, mask_ref, w1_ref, b1_ref, w2_ref, b2_ref,
                            o_ref):
    # x_ref:    (1, 16, HW)   4 views x 4 channels in sublanes, spatial in lanes
    # mask_ref: (9, HW)       precomputed halo masks, tap-major (row-major 3x3)
    # w1_ref:   (24, 144)     layer-1 block-diagonal weights (BN scale folded)
    # b1_ref:   (24, 1)       layer-1 folded bias + BN shift
    # w2_ref:   (36, 216)     layer-2 block-diagonal weights (folded)
    # b2_ref:   (36, 1)       layer-2 shift
    # o_ref:    (1, 36, HW)   lane-dense output block (torch.cat channel order)
    HW = x_ref.shape[-1]
    taps = [oy * W + ox for oy in (-1, 0, 1) for ox in (-1, 0, 1)]

    def roll_lanes(z, s):
        amt = (-s) % HW
        if amt == 0:
            return z
        if HW % 128 == 0:
            return pltpu.roll(z, amt, axis=1)     # XLU lane rotate
        return jnp.roll(z, amt, axis=1)           # general fallback

    def im2col(z):
        # z: (C, HW) with C a multiple of 8 -> (9*C, HW), tap-major,
        # every concat piece lands on an 8-sublane vreg boundary.
        pieces = []
        for t, s in enumerate(taps):
            if s == 0:                             # center tap: mask is all-ones
                pieces.append(z)
                continue
            m = mask_ref[pl.ds(t, 1), :]           # (1, HW), shared by both layers
            pieces.append(roll_lanes(z, s) * m)
        return jnp.concatenate(pieces, axis=0)

    x = x_ref[0]                                   # (16, HW)

    # Layer 1: 4 views x (4 -> 6 ch) as one block-diagonal matmul, K = 144.
    h1 = jnp.dot(w1_ref[...], im2col(x), preferred_element_type=jnp.float32)
    h1 = jnp.maximum(h1 + b1_ref[...], 0.0)        # (24, HW)

    # Layer 2: 4 views x (6 -> 9 ch) as one block-diagonal matmul, K = 216.
    h2 = jnp.dot(w2_ref[...], im2col(h1), preferred_element_type=jnp.float32)
    h2 = jnp.maximum(h2 + b2_ref[...], 0.0)        # (36, HW)

    o_ref[0] = h2


# ---------------------------------------------------------------------------
# Parameter folding / packing (done once inside the jitted wrapper).
# ---------------------------------------------------------------------------
def _fold_conv_bn(p, eps=1e-5):
    """Conv(3x3, bias) + inference BatchNorm -> (Cout, 9, Cin) weights with the
    BN scale folded in (tap-major, ci-minor), plus a (Cout,) shift."""
    w, b = p["w"], p["b"]                                 # w: (3, 3, Cin, Cout)
    cin, cout = w.shape[2], w.shape[3]
    scale = p["gamma"] / jnp.sqrt(p["var"] + eps)         # (Cout,)
    shift = (b - p["mean"]) * scale + p["beta"]           # (Cout,)
    wp = jnp.transpose(w, (3, 0, 1, 2)).reshape(cout, 9, cin)
    wp = wp * scale[:, None, None]
    return wp.astype(jnp.float32), shift.astype(jnp.float32)


def _pack_layer_block_diag(params, prefix, V, cin, cout):
    """Pack V per-view folded convs into one block-diagonal (V*cout, 9*V*cin)
    matrix (column = tap*(V*cin) + view*cin + ci) and a (V*cout, 1) shift."""
    Wbd = jnp.zeros((V * cout, 9, V * cin), jnp.float32)
    bbd = jnp.zeros((V * cout,), jnp.float32)
    for v in range(V):
        wp, sh = _fold_conv_bn(params[f"{prefix}_{v + 1}"])
        Wbd = Wbd.at[v * cout:(v + 1) * cout, :, v * cin:(v + 1) * cin].set(wp)
        bbd = bbd.at[v * cout:(v + 1) * cout].set(sh)
    return Wbd.reshape(V * cout, 9 * V * cin), bbd.reshape(V * cout, 1)


# ---------------------------------------------------------------------------
# Forward: four NCHW views -> one fused pallas_call -> NCHW (B, 36, H, W).
# ---------------------------------------------------------------------------
@jax.jit
def multiview_forward(params, x1, x2, x3, x4):
    """Inputs are NCHW (PyTorch convention), each of shape (B, 4, H, W)."""
    B, Cin, H, W = x1.shape
    HW = H * W
    V, C1, C2 = 4, 6, 9

    # Stack views and flatten spatial into the lane dimension: (B, 16, HW).
    x_all = jnp.stack([x1, x2, x3, x4], axis=1).astype(jnp.float32)
    x_all = x_all.reshape(B, V * Cin, HW)

    # Precomputed halo masks (9, HW), tap-major over (oy, ox) in (-1, 0, 1)^2.
    pix = jnp.arange(HW, dtype=jnp.int32)
    row, col = pix // W, pix % W
    masks = []
    for oy in (-1, 0, 1):
        for ox in (-1, 0, 1):
            masks.append((row + oy >= 0) & (row + oy < H) &
                         (col + ox >= 0) & (col + ox < W))
    mask = jnp.stack(masks).astype(jnp.float32)                 # (9, HW)

    w1, b1 = _pack_layer_block_diag(params, "conv_1", V, Cin, C1)  # (24,144),(24,1)
    w2, b2 = _pack_layer_block_diag(params, "conv_2", V, C1, C2)   # (36,216),(36,1)

    kernel = functools.partial(_fused_multiview_kernel, W)

    flops = 2 * B * HW * ((V * C1) * (9 * V * Cin) + (V * C2) * (9 * V * C1))
    bytes_accessed = 4 * (x_all.size + B * V * C2 * HW            # in + out per call
                          + mask.size + w1.size + b1.size + w2.size + b2.size)

    out = pl.pallas_call(
        kernel,
        out_shape=jax.ShapeDtypeStruct((B, V * C2, HW), jnp.float32),
        grid=(B,),
        in_specs=[
            pl.BlockSpec((1, V * Cin, HW), lambda b: (b, 0, 0)),
            pl.BlockSpec((9, HW), lambda b: (0, 0)),              # resident
            pl.BlockSpec((V * C1, 9 * V * Cin), lambda b: (0, 0)),  # resident
            pl.BlockSpec((V * C1, 1), lambda b: (0, 0)),          # resident
            pl.BlockSpec((V * C2, 9 * V * C1), lambda b: (0, 0)),  # resident
            pl.BlockSpec((V * C2, 1), lambda b: (0, 0)),          # resident
        ],
        out_specs=pl.BlockSpec((1, V * C2, HW), lambda b: (b, 0, 0)),
        compiler_params=pltpu.CompilerParams(
            dimension_semantics=("parallel",)),
        cost_estimate=pl.CostEstimate(
            flops=flops, transcendentals=0, bytes_accessed=bytes_accessed),
    )(x_all, mask, w1, b1, w2, b2)

    # (B, 36, HW) -> (B, 36, H, W): contiguous reshape (free), channel order
    # already matches torch.cat([view1, view2, view3, view4], axis=1).
    # TODO(synk): feed this 36-channel map into the smp.Unet second-stage network.
    return out.reshape(B, V * C2, H, W)


# ---------------------------------------------------------------------------
# Deterministic parameter construction (Conv2d + BatchNorm2d per block).
# ---------------------------------------------------------------------------
def make_conv_bn_params(key, cin, cout):
    kw, kb, kg, kbeta, km, kv = jax.random.split(key, 6)
    return dict(
        w=0.1 * jax.random.normal(kw, (3, 3, cin, cout), jnp.float32),
        b=0.1 * jax.random.normal(kb, (cout,), jnp.float32),
        gamma=1.0 + 0.1 * jax.random.normal(kg, (cout,), jnp.float32),
        beta=0.1 * jax.random.normal(kbeta, (cout,), jnp.float32),
        mean=0.1 * jax.random.normal(km, (cout,), jnp.float32),
        var=1.0 + 0.1 * jnp.abs(jax.random.normal(kv, (cout,), jnp.float32)),
    )


def init_multiview_params(key):
    params = {}
    keys = jax.random.split(key, 8)
    for v in range(4):
        params[f"conv_1_{v + 1}"] = make_conv_bn_params(keys[2 * v], 4, 6)
        params[f"conv_2_{v + 1}"] = make_conv_bn_params(keys[2 * v + 1], 6, 9)
    return params


# ---------------------------------------------------------------------------
# Pure-JAX reference (XLA conv) for numerical validation.
# ---------------------------------------------------------------------------
def _ref_conv_bn_relu(x, p, eps=1e-5):
    w_oihw = jnp.transpose(p["w"], (3, 2, 0, 1))
    y = jax.lax.conv_general_dilated(
        x, w_oihw, window_strides=(1, 1), padding=((1, 1), (1, 1)),
        dimension_numbers=("NCHW", "OIHW", "NCHW"),
        precision=jax.lax.Precision.HIGHEST)
    y = y + p["b"][None, :, None, None]
    scale = (p["gamma"] / jnp.sqrt(p["var"] + eps))[None, :, None, None]
    y = (y - p["mean"][None, :, None, None]) * scale + p["beta"][None, :, None, None]
    return jnp.maximum(y, 0.0)


def _ref_forward(params, x1, x2, x3, x4):
    outs = []
    for v, x in enumerate((x1, x2, x3, x4), start=1):
        h = _ref_conv_bn_relu(x, params[f"conv_1_{v}"])
        h = _ref_conv_bn_relu(h, params[f"conv_2_{v}"])
        outs.append(h)
    return jnp.concatenate(outs, axis=1)


if __name__ == "__main__":
    key = jax.random.PRNGKey(0)
    k_params, k1, k2, k3, k4 = jax.random.split(key, 5)

    B, C, H, W = 2, 4, 16, 16
    x1 = jax.random.normal(k1, (B, C, H, W), jnp.float32)
    x2 = jax.random.normal(k2, (B, C, H, W), jnp.float32)
    x3 = jax.random.normal(k3, (B, C, H, W), jnp.float32)
    x4 = jax.random.normal(k4, (B, C, H, W), jnp.float32)

    params = init_multiview_params(k_params)

    out = jax.block_until_ready(multiview_forward(params, x1, x2, x3, x4))
    assert out.shape == (B, 36, H, W), out.shape
    assert bool(jnp.all(out >= 0.0)), "ReLU output must be non-negative"

    ref = jax.block_until_ready(_ref_forward(params, x1, x2, x3, x4))
    err = jnp.abs(out - ref)
    tol = 2e-2 + 2e-2 * jnp.abs(ref)
    max_excess = float(jnp.max(err - tol))
    assert max_excess <= 0.0, f"mismatch vs XLA reference (excess={max_excess})"

    print("KERNEL_OK")
</pallas_src>

<mosaic_0001>
module attributes {stable_mosaic.version = 11 : i64} {
  func.func @_fused_multiview_kernel(%arg0: i32, %arg1: memref<1x16x256xf32, #tpu.memory_space<vmem>>, %arg2: memref<9x256xf32, #tpu.memory_space<vmem>>, %arg3: memref<24x144xf32, #tpu.memory_space<vmem>>, %arg4: memref<24x1xf32, #tpu.memory_space<vmem>>, %arg5: memref<36x216xf32, #tpu.memory_space<vmem>>, %arg6: memref<36x1xf32, #tpu.memory_space<vmem>>, %arg7: memref<1x36x256xf32, #tpu.memory_space<vmem>>) attributes {dimension_semantics = [#tpu.dimension_semantics<parallel>], iteration_bounds = array<i64: 2>, scalar_prefetch = 0 : i64, scratch_operands = 0 : i64, tpu.core_type = #tpu.core_type<tc>, window_params = [{transform_indices = @transform_0, window_bounds = array<i64: 1, 16, 256>}, {pipeline_mode = #tpu.pipeline_mode<synchronous>, transform_indices = @transform_1, window_bounds = array<i64: 9, 256>}, {pipeline_mode = #tpu.pipeline_mode<synchronous>, transform_indices = @transform_2, window_bounds = array<i64: 24, 144>}, {pipeline_mode = #tpu.pipeline_mode<synchronous>, transform_indices = @transform_3, window_bounds = array<i64: 24, 1>}, {pipeline_mode = #tpu.pipeline_mode<synchronous>, transform_indices = @transform_4, window_bounds = array<i64: 36, 216>}, {pipeline_mode = #tpu.pipeline_mode<synchronous>, transform_indices = @transform_5, window_bounds = array<i64: 36, 1>}, {transform_indices = @transform_6, window_bounds = array<i64: 1, 36, 256>}]} {
    %c0 = arith.constant 0 : index
    %c0_0 = arith.constant 0 : index
    %c0_1 = arith.constant 0 : index
    %0 = vector.load %arg1[%c0, %c0_0, %c0_1] : memref<1x16x256xf32, #tpu.memory_space<vmem>>, vector<1x16x256xf32>
    %1 = vector.shape_cast %0 : vector<1x16x256xf32> to vector<16x256xf32>
    %c0_2 = arith.constant 0 : index
    %c0_3 = arith.constant 0 : index
    %2 = vector.load %arg3[%c0_2, %c0_3] : memref<24x144xf32, #tpu.memory_space<vmem>>, vector<24x144xf32>
    %c0_4 = arith.constant 0 : index
    %c0_5 = arith.constant 0 : index
    %3 = vector.load %arg2[%c0_4, %c0_5] : memref<9x256xf32, #tpu.memory_space<vmem>>, vector<1x256xf32>
    %c17_i32 = arith.constant 17 : i32
    %4 = tpu.dynamic_rotate %1 by %c17_i32 dim 1 : vector<16x256xf32>, i32 -> vector<16x256xf32>
    %5 = vector.broadcast %3 : vector<1x256xf32> to vector<16x256xf32>
    %6 = arith.mulf %4, %5 : vector<16x256xf32>
    %c1 = arith.constant 1 : index
    %c0_6 = arith.constant 0 : index
    %7 = vector.load %arg2[%c1, %c0_6] : memref<9x256xf32, #tpu.memory_space<vmem>>, vector<1x256xf32>
    %c16_i32 = arith.constant 16 : i32
    %8 = tpu.dynamic_rotate %1 by %c16_i32 dim 1 : vector<16x256xf32>, i32 -> vector<16x256xf32>
    %9 = vector.broadcast %7 : vector<1x256xf32> to vector<16x256xf32>
    %10 = arith.mulf %8, %9 : vector<16x256xf32>
    %c2 = arith.constant 2 : index
    %c0_7 = arith.constant 0 : index
    %11 = vector.load %arg2[%c2, %c0_7] : memref<9x256xf32, #tpu.memory_space<vmem>>, vector<1x256xf32>
    %c15_i32 = arith.constant 15 : i32
    %12 = tpu.dynamic_rotate %1 by %c15_i32 dim 1 : vector<16x256xf32>, i32 -> vector<16x256xf32>
    %13 = vector.broadcast %11 : vector<1x256xf32> to vector<16x256xf32>
    %14 = arith.mulf %12, %13 : vector<16x256xf32>
    %c3 = arith.constant 3 : index
    %c0_8 = arith.constant 0 : index
    %15 = vector.load %arg2[%c3, %c0_8] : memref<9x256xf32, #tpu.memory_space<vmem>>, vector<1x256xf32>
    %c1_i32 = arith.constant 1 : i32
    %16 = tpu.dynamic_rotate %1 by %c1_i32 dim 1 : vector<16x256xf32>, i32 -> vector<16x256xf32>
    %17 = vector.broadcast %15 : vector<1x256xf32> to vector<16x256xf32>
    %18 = arith.mulf %16, %17 : vector<16x256xf32>
    %c5 = arith.constant 5 : index
    %c0_9 = arith.constant 0 : index
    %19 = vector.load %arg2[%c5, %c0_9] : memref<9x256xf32, #tpu.memory_space<vmem>>, vector<1x256xf32>
    %c255_i32 = arith.constant 255 : i32
    %20 = tpu.dynamic_rotate %1 by %c255_i32 dim 1 : vector<16x256xf32>, i32 -> vector<16x256xf32>
    %21 = vector.broadcast %19 : vector<1x256xf32> to vector<16x256xf32>
    %22 = arith.mulf %20, %21 : vector<16x256xf32>
    %c6 = arith.constant 6 : index
    %c0_10 = arith.constant 0 : index
    %23 = vector.load %arg2[%c6, %c0_10] : memref<9x256xf32, #tpu.memory_space<vmem>>, vector<1x256xf32>
    %c241_i32 = arith.constant 241 : i32
    %24 = tpu.dynamic_rotate %1 by %c241_i32 dim 1 : vector<16x256xf32>, i32 -> vector<16x256xf32>
    %25 = vector.broadcast %23 : vector<1x256xf32> to vector<16x256xf32>
    %26 = arith.mulf %24, %25 : vector<16x256xf32>
    %c7 = arith.constant 7 : index
    %c0_11 = arith.constant 0 : index
    %27 = vector.load %arg2[%c7, %c0_11] : memref<9x256xf32, #tpu.memory_space<vmem>>, vector<1x256xf32>
    %c240_i32 = arith.constant 240 : i32
    %28 = tpu.dynamic_rotate %1 by %c240_i32 dim 1 : vector<16x256xf32>, i32 -> vector<16x256xf32>
    %29 = vector.broadcast %27 : vector<1x256xf32> to vector<16x256xf32>
    %30 = arith.mulf %28, %29 : vector<16x256xf32>
    %c8 = arith.constant 8 : index
    %c0_12 = arith.constant 0 : index
    %31 = vector.load %arg2[%c8, %c0_12] : memref<9x256xf32, #tpu.memory_space<vmem>>, vector<1x256xf32>
    %c239_i32 = arith.constant 239 : i32
    %32 = tpu.dynamic_rotate %1 by %c239_i32 dim 1 : vector<16x256xf32>, i32 -> vector<16x256xf32>
    %33 = vector.broadcast %31 : vector<1x256xf32> to vector<16x256xf32>
    %34 = arith.mulf %32, %33 : vector<16x256xf32>
    %35 = tpu.concatenate %6, %10, %14, %18, %1, %22, %26, %30, %34 in 0 : vector<16x256xf32>, vector<16x256xf32>, vector<16x256xf32>, vector<16x256xf32>, vector<16x256xf32>, vector<16x256xf32>, vector<16x256xf32>, vector<16x256xf32>, vector<16x256xf32> -> vector<144x256xf32>
    %cst = arith.constant dense<0.000000e+00> : vector<24x256xf32>
    %36 = tpu.matmul %2, %35, %cst {dimension_numbers = #tpu.dot_dimension_numbers<[1], [0], [0], [1], [0, 0, 1, 1], [], []>} : vector<24x144xf32>, vector<144x256xf32>, vector<24x256xf32> -> vector<24x256xf32>
    %c0_13 = arith.constant 0 : index
    %c0_14 = arith.constant 0 : index
    %37 = vector.load %arg4[%c0_13, %c0_14] : memref<24x1xf32, #tpu.memory_space<vmem>>, vector<24x1xf32>
    %38 = vector.broadcast %37 : vector<24x1xf32> to vector<24x256xf32>
    %39 = arith.addf %36, %38 : vector<24x256xf32>
    %cst_15 = arith.constant 0.000000e+00 : f32
    %40 = vector.broadcast %cst_15 : f32 to vector<24x256xf32>
    %41 = arith.maximumf %39, %40 : vector<24x256xf32>
    %c0_16 = arith.constant 0 : index
    %c0_17 = arith.constant 0 : index
    %42 = vector.load %arg5[%c0_16, %c0_17] : memref<36x216xf32, #tpu.memory_space<vmem>>, vector<36x216xf32>
    %c0_18 = arith.constant 0 : index
    %c0_19 = arith.constant 0 : index
    %43 = vector.load %arg2[%c0_18, %c0_19] : memref<9x256xf32, #tpu.memory_space<vmem>>, vector<1x256xf32>
    %c17_i32_20 = arith.constant 17 : i32
    %44 = tpu.dynamic_rotate %41 by %c17_i32_20 dim 1 : vector<24x256xf32>, i32 -> vector<24x256xf32>
    %45 = vector.broadcast %43 : vector<1x256xf32> to vector<24x256xf32>
    %46 = arith.mulf %44, %45 : vector<24x256xf32>
    %c1_21 = arith.constant 1 : index
    %c0_22 = arith.constant 0 : index
    %47 = vector.load %arg2[%c1_21, %c0_22] : memref<9x256xf32, #tpu.memory_space<vmem>>, vector<1x256xf32>
    %c16_i32_23 = arith.constant 16 : i32
    %48 = tpu.dynamic_rotate %41 by %c16_i32_23 dim 1 : vector<24x256xf32>, i32 -> vector<24x256xf32>
    %49 = vector.broadcast %47 : vector<1x256xf32> to vector<24x256xf32>
    %50 = arith.mulf %48, %49 : vector<24x256xf32>
    %c2_24 = arith.constant 2 : index
    %c0_25 = arith.constant 0 : index
    %51 = vector.load %arg2[%c2_24, %c0_25] : memref<9x256xf32, #tpu.memory_space<vmem>>, vector<1x256xf32>
    %c15_i32_26 = arith.constant 15 : i32
    %52 = tpu.dynamic_rotate %41 by %c15_i32_26 dim 1 : vector<24x256xf32>, i32 -> vector<24x256xf32>
    %53 = vector.broadcast %51 : vector<1x256xf32> to vector<24x256xf32>
    %54 = arith.mulf %52, %53 : vector<24x256xf32>
    %c3_27 = arith.constant 3 : index
    %c0_28 = arith.constant 0 : index
    %55 = vector.load %arg2[%c3_27, %c0_28] : memref<9x256xf32, #tpu.memory_space<vmem>>, vector<1x256xf32>
    %c1_i32_29 = arith.constant 1 : i32
    %56 = tpu.dynamic_rotate %41 by %c1_i32_29 dim 1 : vector<24x256xf32>, i32 -> vector<24x256xf32>
    %57 = vector.broadcast %55 : vector<1x256xf32> to vector<24x256xf32>
    %58 = arith.mulf %56, %57 : vector<24x256xf32>
    %c5_30 = arith.constant 5 : index
    %c0_31 = arith.constant 0 : index
    %59 = vector.load %arg2[%c5_30, %c0_31] : memref<9x256xf32, #tpu.memory_space<vmem>>, vector<1x256xf32>
    %c255_i32_32 = arith.constant 255 : i32
    %60 = tpu.dynamic_rotate %41 by %c255_i32_32 dim 1 : vector<24x256xf32>, i32 -> vector<24x256xf32>
    %61 = vector.broadcast %59 : vector<1x256xf32> to vector<24x256xf32>
    %62 = arith.mulf %60, %61 : vector<24x256xf32>
    %c6_33 = arith.constant 6 : index
    %c0_34 = arith.constant 0 : index
    %63 = vector.load %arg2[%c6_33, %c0_34] : memref<9x256xf32, #tpu.memory_space<vmem>>, vector<1x256xf32>
    %c241_i32_35 = arith.constant 241 : i32
    %64 = tpu.dynamic_rotate %41 by %c241_i32_35 dim 1 : vector<24x256xf32>, i32 -> vector<24x256xf32>
    %65 = vector.broadcast %63 : vector<1x256xf32> to vector<24x256xf32>
    %66 = arith.mulf %64, %65 : vector<24x256xf32>
    %c7_36 = arith.constant 7 : index
    %c0_37 = arith.constant 0 : index
    %67 = vector.load %arg2[%c7_36, %c0_37] : memref<9x256xf32, #tpu.memory_space<vmem>>, vector<1x256xf32>
    %c240_i32_38 = arith.constant 240 : i32
    %68 = tpu.dynamic_rotate %41 by %c240_i32_38 dim 1 : vector<24x256xf32>, i32 -> vector<24x256xf32>
    %69 = vector.broadcast %67 : vector<1x256xf32> to vector<24x256xf32>
    %70 = arith.mulf %68, %69 : vector<24x256xf32>
    %c8_39 = arith.constant 8 : index
    %c0_40 = arith.constant 0 : index
    %71 = vector.load %arg2[%c8_39, %c0_40] : memref<9x256xf32, #tpu.memory_space<vmem>>, vector<1x256xf32>
    %c239_i32_41 = arith.constant 239 : i32
    %72 = tpu.dynamic_rotate %41 by %c239_i32_41 dim 1 : vector<24x256xf32>, i32 -> vector<24x256xf32>
    %73 = vector.broadcast %71 : vector<1x256xf32> to vector<24x256xf32>
    %74 = arith.mulf %72, %73 : vector<24x256xf32>
    %75 = tpu.concatenate %46, %50, %54, %58, %41, %62, %66, %70, %74 in 0 : vector<24x256xf32>, vector<24x256xf32>, vector<24x256xf32>, vector<24x256xf32>, vector<24x256xf32>, vector<24x256xf32>, vector<24x256xf32>, vector<24x256xf32>, vector<24x256xf32> -> vector<216x256xf32>
    %cst_42 = arith.constant dense<0.000000e+00> : vector<36x256xf32>
    %76 = tpu.matmul %42, %75, %cst_42 {dimension_numbers = #tpu.dot_dimension_numbers<[1], [0], [0], [1], [0, 0, 1, 1], [], []>} : vector<36x216xf32>, vector<216x256xf32>, vector<36x256xf32> -> vector<36x256xf32>
    %c0_43 = arith.constant 0 : index
    %c0_44 = arith.constant 0 : index
    %77 = vector.load %arg6[%c0_43, %c0_44] : memref<36x1xf32, #tpu.memory_space<vmem>>, vector<36x1xf32>
    %78 = vector.broadcast %77 : vector<36x1xf32> to vector<36x256xf32>
    %79 = arith.addf %76, %78 : vector<36x256xf32>
    %cst_45 = arith.constant 0.000000e+00 : f32
    %80 = vector.broadcast %cst_45 : f32 to vector<36x256xf32>
    %81 = arith.maximumf %79, %80 : vector<36x256xf32>
    %c0_46 = arith.constant 0 : index
    %c0_47 = arith.constant 0 : index
    %c0_48 = arith.constant 0 : index
    %82 = vector.load %arg7[%c0_46, %c0_47, %c0_48] : memref<1x36x256xf32, #tpu.memory_space<vmem>>, vector<1x36x256xf32>
    %83 = vector.shape_cast %82 : vector<1x36x256xf32> to vector<36x256xf32>
    %84 = vector.shape_cast %81 : vector<36x256xf32> to vector<1x36x256xf32>
    tpu.vector_store %arg7[%c0_46, %c0_47, %c0_48], %84 {strides = array<i32>} : memref<1x36x256xf32, #tpu.memory_space<vmem>>, vector<1x36x256xf32>,
    return
  }
  func.func @transform_0(%arg0: i32) -> (i32, i32, i32) {
    %c0_i32 = arith.constant 0 : i32
    %c0_i32_0 = arith.constant 0 : i32
    %c0_i32_1 = arith.constant 0 : i32
    return %arg0, %c0_i32, %c0_i32_0 : i32, i32, i32
  }
  func.func @transform_1(%arg0: i32) -> (i32, i32) {
    %c0_i32 = arith.constant 0 : i32
    %c0_i32_0 = arith.constant 0 : i32
    %c0_i32_1 = arith.constant 0 : i32
    return %c0_i32, %c0_i32_0 : i32, i32
  }
  func.func @transform_2(%arg0: i32) -> (i32, i32) {
    %c0_i32 = arith.constant 0 : i32
    %c0_i32_0 = arith.constant 0 : i32
    %c0_i32_1 = arith.constant 0 : i32
    return %c0_i32, %c0_i32_0 : i32, i32
  }
  func.func @transform_3(%arg0: i32) -> (i32, i32) {
    %c0_i32 = arith.constant 0 : i32
    %c0_i32_0 = arith.constant 0 : i32
    %c0_i32_1 = arith.constant 0 : i32
    return %c0_i32, %c0_i32_0 : i32, i32
  }
  func.func @transform_4(%arg0: i32) -> (i32, i32) {
    %c0_i32 = arith.constant 0 : i32
    %c0_i32_0 = arith.constant 0 : i32
    %c0_i32_1 = arith.constant 0 : i32
    return %c0_i32, %c0_i32_0 : i32, i32
  }
  func.func @transform_5(%arg0: i32) -> (i32, i32) {
    %c0_i32 = arith.constant 0 : i32
    %c0_i32_0 = arith.constant 0 : i32
    %c0_i32_1 = arith.constant 0 : i32
    return %c0_i32, %c0_i32_0 : i32, i32
  }
  func.func @transform_6(%arg0: i32) -> (i32, i32, i32) {
    %c0_i32 = arith.constant 0 : i32
    %c0_i32_0 = arith.constant 0 : i32
    %c0_i32_1 = arith.constant 0 : i32
    return %arg0, %c0_i32, %c0_i32_0 : i32, i32, i32
  }
}

</mosaic_0001>

<bundles_post_ra>
// kernel: multiview_forward.1
= control target key start
LH: loop header
LB: loop body
LE: loop exit
PB: predicated region body
PF: predicated region fallthrough
CT: control target
= control target key end

     0   :  { %s1224_s21 = smov 0   ;;  %s1895_s0 = inlined_call_operand.vmem [shape: f32[2,16,256], index: 0, kind: input, shape index: {}]   ;;  %s1896_s1 = inlined_call_operand.vmem [shape: f32[9,256], index: 1, kind: input, shape index: {}]   ;;  %s1897_s2 = inlined_call_operand.vmem [shape: f32[24,144], index: 2, kind: input, shape index: {}]   ;;  %s1898_s3 = inlined_call_operand.vmem [shape: f32[24,1], index: 3, kind: input, shape index: {}]   ;;  %s1899_s4 = inlined_call_operand.vmem [shape: f32[36,216], index: 4, kind: input, shape index: {}]   ;;  %s1900_s5 = inlined_call_operand.vmem [shape: f32[36,1], index: 5, kind: input, shape index: {}]   ;;  %s1901_s6 = inlined_call_operand.vmem [shape: f32[2,36,256], index: 6, kind: output, shape index: {}]  }
   0x1 LB: > { %s1038_s22 = sadd.s32 4294967295, %s1178_s21   ;;  %p1042_p0 = scmp.ge.s32.totalorder %s1178_s21, 1  ;;  %s1178_s21 = sphi %s1224_s21, %s16_s21  }
   0x2   : > { %p212_p1 = scmp.lt.s32.totalorder %s1178_s21, 3 }
   0x4   : > { %p213_p2 = pnand %p1042_p0, %p212_p1 }
   0x5   : > { %p242_p3 = scmp.lt.s32.totalorder (!%p213_p2), %s1038_s22, 1  ;;  %s1180_s27 = smov (!%p213_p2), 17   ;;  %v257_v6 = vld [vmem:[%s1897_s2 + $0x8] sm:$0xff] (!%p213_p2)  ;;  %vm521_vm0 = vcmask (!%p213_p2), 130048   ;;  %v503_v7 = vld [vmem:[%s1898_s3] sm:$0xff] (!%p213_p2)  ;;  %v1188_v9 = vmov (!%p213_p2), 0   ;;  %v271_v11 = vlaneseq (!%p213_p2) }
   0x6   : > { %216 = sbr.rel (%p213_p2) target bundleno = 866 (0x362), region = 44  ;;  %s1181_s28 = smov (!%p213_p2), 16   ;;  %1053 = vmatprep.mubr.msk.f32.mxu0 (!%p213_p2), %vm521_vm0, %v257_v6  ;;  %v504_v8 = vld [vmem:[%s1898_s3 + $0x8] sm:$0xff] (!%p213_p2)  ;;  %1170 = vset.pattern.permute.xlu0 (!%p213_p2), %v1188_v9  ;;  %v505_v10 = vld [vmem:[%s1898_s3 + $0x10] sm:$0xff] (!%p213_p2)  ;;  %vm852_vm9 = vcmask (!%p213_p2), 719872  }
   0x7   : > { %s1182_s29 = smov (!%p213_p2), 15   ;;  %s1183_s30 = smov (!%p213_p2), 1   ;;  %1171 = vset.pattern.permute.xlu1 (!%p213_p2), %v1188_v9  ;;  %v280_v12 = vshrl.u32 (!%p213_p2), %v271_v11, 7  ;;  %v1327_v13 = vand.u32 (!%p213_p2), 127, %v271_v11 }
   0x8   : > { %s1184_s7 = smov (!%p213_p2), 127   ;;  %s1185_s8 = smov (!%p213_p2), 113   ;;  %v262_v16 = vld [vmem:[%s1896_s1] ss:$8 sm:$0x3] (!%p213_p2) }
   0x9   : > { %s1186_s9 = smov (!%p213_p2), 112   ;;  %s1187_s12 = smov (!%p213_p2), 111   ;;  %v1329_v14 = vsub.s32 (!%p213_p2), 0, %v280_v12  ;;  %v1331_v15 = vsub.s32 (!%p213_p2), 1, %v280_v12  ;;  %vm273_vm1 = vcmp.lt.s32.totalorder (!%p213_p2), %v1327_v13, 17  ;;  %vm303_vm2 = vcmp.lt.s32.totalorder (!%p213_p2), %v1327_v13, 16 }
   0xa   : > { %v1046_v31 = vld [vmem:[%s1896_s1 + $0x1] ss:$8 sm:$0x3] (!%p213_p2)  ;;  %v1047_v48 = vld [vmem:[%s1896_s1 + $0x2] ss:$8 sm:$0x3] (!%p213_p2) }
   0xb   : > { %v1338_v19 = vrot.slane (!%p213_p2), %v262_v16, %v1329_v14  ;;  %v1341_v20 = vrot.slane (!%p213_p2), %v262_v16, %v1331_v15  ;;  %v1360_v36 = vrot.slane (!%p213_p2), %v1046_v31, %v1329_v14  ;;  %v1363_v37 = vrot.slane (!%p213_p2), %v1046_v31, %v1331_v15 }
   0xc   : > { %vm333_vm3 = vcmp.lt.s32.totalorder (!%p213_p2), %v1327_v13, 15  ;;  %v1382_v53 = vrot.slane (!%p213_p2), %v1047_v48, %v1329_v14  ;;  %v1385_v54 = vrot.slane (!%p213_p2), %v1047_v48, %v1331_v15  ;;  %vm363_vm4 = vcmp.lt.s32.totalorder (!%p213_p2), %v1327_v13, 1 }
   0xd   : > { %s1903_s22 = smov (!%p242_p3, %s1038_s22), 1  ;;  %vm393_vm5 = vcmp.lt.s32.totalorder %v1327_v13, 127  ;;  %vm423_vm6 = vcmp.lt.s32.totalorder %v1327_v13, 113  ;;  %vm453_vm7 = vcmp.lt.s32.totalorder %v1327_v13, 112  ;;  %vm483_vm8 = vcmp.lt.s32.totalorder %v1327_v13, 111  ;;  %v622_v13 = vld [vmem:[%s1899_s4 + $0x10] sm:$0xff] }
   0xe   : > { %s1063_s23 = sshll.u32 %s1903_s22, 5  ;;  %s1152_s18 = smul.u32 80, %s1903_s22 }
   0xf   : > { %s246_s26 = scalar_lea.vmem %s1895_s0, %s1063_s23 }
  0x10   : > { %v1238_v0 = vld [vmem:[%s246_s26 + $0x8] sm:$0xff]  ;;  %v1240_v1 = vld [vmem:[%s246_s26] sm:$0xff]  ;;  %v1246_v2 = vld [vmem:[%s246_s26 + $0x18] sm:$0xff]  ;;  %s1880_s20 = scalar_lea.vmem %s1901_s6, %s1152_s18 }
  0x11   : > { %267 = vrot.lane.b32.xlu1 %v1238_v0, %s1180_s27  ;;  %263 = vrot.lane.b32.xlu0 %v1240_v1, %s1180_s27  ;;  %v1248_v3 = vld [vmem:[%s246_s26 + $0x10] sm:$0xff]  ;;  %v1080_v4 = vpack.c.bf16 %v1246_v2, %v1238_v0 }
  0x12   : > { %v1082_v5 = vpack.c.bf16 %v1248_v3, %v1240_v1 }
  0x15   : > { %269 = vrot.lane.b32.xlu1 %v1246_v2, %s1180_s27  ;;  %265 = vrot.lane.b32.xlu0 %v1248_v3, %s1180_s27 }
  0x19   : > { %297 = vrot.lane.b32.xlu1 %v1248_v3, %s1181_s28  ;;  %295 = vrot.lane.b32.xlu0 %v1240_v1, %s1181_s28 }
  0x1d   : > { %301 = vrot.lane.b32.xlu1 %v1246_v2, %s1181_s28  ;;  %299 = vrot.lane.b32.xlu0 %v1238_v0, %s1181_s28 }
  0x21   : > { %327 = vrot.lane.b32.xlu1 %v1248_v3, %s1182_s29  ;;  %325 = vrot.lane.b32.xlu0 %v1240_v1, %s1182_s29 }
  0x25   : > { %331 = vrot.lane.b32.xlu1 %v1246_v2, %s1182_s29  ;;  %329 = vrot.lane.b32.xlu0 %v1238_v0, %s1182_s29 }
  0x29   : > { %357 = vrot.lane.b32.xlu1 %v1248_v3, %s1183_s30  ;;  %355 = vrot.lane.b32.xlu0 %v1240_v1, %s1183_s30 }
  0x2d   : > { %361 = vrot.lane.b32.xlu1 %v1246_v2, %s1183_s30  ;;  %359 = vrot.lane.b32.xlu0 %v1238_v0, %s1183_s30 }
  0x31   : > { %387 = vrot.lane.b32.xlu1 %v1248_v3, %s1184_s7  ;;  %385 = vrot.lane.b32.xlu0 %v1240_v1, %s1184_s7 }
  0x35   : > { %391 = vrot.lane.b32.xlu1 %v1246_v2, %s1184_s7  ;;  %389 = vrot.lane.b32.xlu0 %v1238_v0, %s1184_s7 }
  0x39   : > { %417 = vrot.lane.b32.xlu1 %v1248_v3, %s1185_s8  ;;  %415 = vrot.lane.b32.xlu0 %v1240_v1, %s1185_s8 }
  0x3d   : > { %421 = vrot.lane.b32.xlu1 %v1246_v2, %s1185_s8  ;;  %419 = vrot.lane.b32.xlu0 %v1238_v0, %s1185_s8 }
  0x41   : > { %447 = vrot.lane.b32.xlu1 %v1248_v3, %s1186_s9  ;;  %445 = vrot.lane.b32.xlu0 %v1240_v1, %s1186_s9 }
  0x45   : > { %451 = vrot.lane.b32.xlu1 %v1246_v2, %s1186_s9  ;;  %449 = vrot.lane.b32.xlu0 %v1238_v0, %s1186_s9 }
  0x49   : > { %477 = vrot.lane.b32.xlu1 %v1248_v3, %s1187_s12  ;;  %475 = vrot.lane.b32.xlu0 %v1240_v1, %s1187_s12 }
  0x4d   : > { %481 = vrot.lane.b32.xlu1 %v1246_v2, %s1187_s12  ;;  %479 = vrot.lane.b32.xlu0 %v1238_v0, %s1187_s12  ;;  %v1050_v2 = vld [vmem:[%s1896_s1 + $0x6] ss:$8 sm:$0x3] }
  0x51   : > { %508 = vperm.xlu0 %1170, %v503_v7   ;;  %513 = vperm.xlu1 %1171, %v504_v8   ;;  %v1048_v7 = vld [vmem:[%s1896_s1 + $0x3] ss:$8 sm:$0x3] }
  0x52   : > { %v1404_v12 = vrot.slane %v1048_v7, %v1329_v14  ;;  %v1407_v16 = vrot.slane %v1048_v7, %v1331_v15 }
  0x55   : > { %518 = vperm.xlu1 %1171, %v505_v10  }
  0x83   : > { %v268_v17 = vpop.permute.xlu1 %267  ;;  %v264_v18 = vpop.permute.xlu0 %263 }
  0x84   : > { %v274_v21 = vsel %vm273_vm1, %v264_v18, %v268_v17  ;;  %v276_v22 = vsel %vm273_vm1, %v268_v17, %v264_v18 }
  0x85   : > { %v289_v27 = vmul.f32 %v1338_v19, %v276_v22  ;;  %v290_v29 = vmul.f32 %v1341_v20, %v274_v21 }
  0x87   : > { %v270_v23 = vpop.permute.xlu1 %269  ;;  %v266_v24 = vpop.permute.xlu0 %265 }
  0x88   : > { %v275_v25 = vsel %vm273_vm1, %v266_v24, %v270_v23  ;;  %v277_v26 = vsel %vm273_vm1, %v270_v23, %v266_v24 }
  0x89   : > { %v291_v28 = vmul.f32 %v1338_v19, %v277_v26  ;;  %v292_v30 = vmul.f32 %v1341_v20, %v275_v25 }
  0x8b   : > { %v298_v32 = vpop.permute.xlu1 %297  ;;  %v296_v33 = vpop.permute.xlu0 %295  ;;  %v1064_v34 = vpack.c.bf16 %v292_v30, %v290_v29  ;;  %v1066_v35 = vpack.c.bf16 %v291_v28, %v289_v27  ;;  %v1049_v29 = vld [vmem:[%s1896_s1 + $0x5] ss:$8 sm:$0x3] }
  0x8d   : > { %1065 = vmatprep.subr.bf16.mxu0 %v1064_v34  ;;  %v1426_v34 = vrot.slane %v1049_v29, %v1329_v14 }
  0x8e   : > { %1067 = vmatpush1.bf16.msra.mxu0 %v1066_v35  ;;  %v1429_v35 = vrot.slane %v1049_v29, %v1331_v15 }
  0x8f   : > { %v302_v38 = vpop.permute.xlu1 %301  ;;  %v300_v39 = vpop.permute.xlu0 %299 }
  0x90   : > { %v305_v40 = vsel %vm303_vm2, %v298_v32, %v302_v38  ;;  %v307_v41 = vsel %vm303_vm2, %v302_v38, %v298_v32  ;;  %v304_v42 = vsel %vm303_vm2, %v296_v33, %v300_v39  ;;  %v306_v43 = vsel %vm303_vm2, %v300_v39, %v296_v33 }
  0x91   : > { %v321_v44 = vmul.f32 %v1360_v36, %v307_v41  ;;  %v322_v45 = vmul.f32 %v1363_v37, %v305_v40  ;;  %v319_v46 = vmul.f32 %v1360_v36, %v306_v43  ;;  %v320_v47 = vmul.f32 %v1363_v37, %v304_v42 }
  0x93   : > { %v328_v49 = vpop.permute.xlu1 %327  ;;  %v326_v50 = vpop.permute.xlu0 %325  ;;  %v1068_v51 = vpack.c.bf16 %v322_v45, %v320_v47  ;;  %v1070_v52 = vpack.c.bf16 %v321_v44, %v319_v46 }
  0x95   : > { %1069 = vmatprep.subr.bf16.mxu0 %v1068_v51  ;;  %v1457_v51 = vrot.slane %v1050_v2, %v1331_v15 }
  0x96   : > { %1071 = vmatpush1.bf16.msra.mxu0 %v1070_v52 }
  0x97   : > { %v332_v55 = vpop.permute.xlu1 %331  ;;  %v330_v56 = vpop.permute.xlu0 %329 }
  0x98   : > { %v335_v57 = vsel %vm333_vm3, %v328_v49, %v332_v55  ;;  %v337_v58 = vsel %vm333_vm3, %v332_v55, %v328_v49  ;;  %v334_v59 = vsel %vm333_vm3, %v326_v50, %v330_v56  ;;  %v336_v60 = vsel %vm333_vm3, %v330_v56, %v326_v50 }
  0x99   : > { %v351_v61 = vmul.f32 %v1382_v53, %v337_v58  ;;  %v352_v62 = vmul.f32 %v1385_v54, %v335_v57  ;;  %v349_v63 = vmul.f32 %v1382_v53, %v336_v60  ;;  %v350_v6 = vmul.f32 %v1385_v54, %v334_v59 }
  0x9a   : > { %v1454_v50 = vrot.slane %v1050_v2, %v1329_v14  ;;  %v256_v2 = vld [vmem:[%s1897_s2] sm:$0xff] }
  0x9b   : > { %v358_v8 = vpop.permute.xlu1 %357  ;;  %v356_v9 = vpop.permute.xlu0 %355  ;;  %v1072_v10 = vpack.c.bf16 %v352_v62, %v350_v6  ;;  %v1074_v11 = vpack.c.bf16 %v351_v61, %v349_v63  ;;  %v1051_v61 = vld [vmem:[%s1896_s1 + $0x7] ss:$8 sm:$0x3] }
  0x9d   : > { %1073 = vmatprep.subr.bf16.mxu0 %v1072_v10 }
  0x9e   : > { %1075 = vmatpush1.bf16.msra.mxu0 %v1074_v11 }
  0x9f   : > { %v362_v17 = vpop.permute.xlu1 %361  ;;  %v360_v18 = vpop.permute.xlu0 %359 }
  0xa0   : > { %v365_v21 = vsel %vm363_vm4, %v358_v8, %v362_v17  ;;  %v367_v22 = vsel %vm363_vm4, %v362_v17, %v358_v8  ;;  %v364_v23 = vsel %vm363_vm4, %v356_v9, %v360_v18  ;;  %v366_v24 = vsel %vm363_vm4, %v360_v18, %v356_v9 }
  0xa1   : > { %v381_v25 = vmul.f32 %v1404_v12, %v367_v22  ;;  %v382_v26 = vmul.f32 %v1407_v16, %v365_v21  ;;  %v379_v27 = vmul.f32 %v1404_v12, %v366_v24  ;;  %v380_v28 = vmul.f32 %v1407_v16, %v364_v23 }
  0xa2   : > { %v1476_v8 = vrot.slane %v1051_v61, %v1329_v14  ;;  %v1479_v9 = vrot.slane %v1051_v61, %v1331_v15 }
  0xa3   : > { %v388_v30 = vpop.permute.xlu1 %387  ;;  %v386_v31 = vpop.permute.xlu0 %385  ;;  %v1076_v32 = vpack.c.bf16 %v382_v26, %v380_v28  ;;  %v1078_v33 = vpack.c.bf16 %v381_v25, %v379_v27  ;;  %v1052_v27 = vld [vmem:[%s1896_s1 + $0x10] ss:$8 sm:$0x3] }
  0xa5   : > { %1077 = vmatprep.subr.bf16.mxu0 %v1076_v32  ;;  %v1498_v32 = vrot.slane %v1052_v27, %v1329_v14 }
  0xa6   : > { %1079 = vmatpush1.bf16.msra.mxu0 %v1078_v33  ;;  %v1501_v33 = vrot.slane %v1052_v27, %v1331_v15  ;;  %v825_v27 = vld [vmem:[%s1900_s5 + $0x18] sm:$0xff] }
  0xa7   : > { %v392_v38 = vpop.permute.xlu1 %391  ;;  %v390_v39 = vpop.permute.xlu0 %389  ;;  %1081 = vmatprep.subr.bf16.mxu0 %v1080_v4 }
  0xa8   : > { %v395_v40 = vsel %vm393_vm5, %v388_v30, %v392_v38  ;;  %v397_v41 = vsel %vm393_vm5, %v392_v38, %v388_v30  ;;  %v394_v42 = vsel %vm393_vm5, %v386_v31, %v390_v39  ;;  %v396_v43 = vsel %vm393_vm5, %v390_v39, %v386_v31 }
  0xa9   : > { %v411_v44 = vmul.f32 %v1426_v34, %v395_v40  ;;  %v412_v45 = vmul.f32 %v1429_v35, %v397_v41  ;;  %v409_v46 = vmul.f32 %v1426_v34, %v394_v42  ;;  %v410_v0 = vmul.f32 %v1429_v35, %v396_v43 }
  0xaa   : > { %1083 = vmatpush1.bf16.msra.mxu0 %v1082_v5 }
  0xab   : > { %v418_v4 = vpop.permute.xlu1 %417  ;;  %v416_v47 = vpop.permute.xlu0 %415  ;;  %v1084_v48 = vpack.c.bf16 %v412_v45, %v410_v0  ;;  %v1086_v49 = vpack.c.bf16 %v411_v44, %v409_v46 }
  0xad   : > { %1085 = vmatprep.subr.bf16.mxu0 %v1084_v48  ;;  %v261_v48 = vld [vmem:[%s1897_s2 + $0x28] sm:$0xff] }
  0xae   : > { %1087 = vmatpush1.bf16.msra.mxu0 %v1086_v49  ;;  %v260_v49 = vld [vmem:[%s1897_s2 + $0x20] sm:$0xff] }
  0xaf   : > { %v422_v1 = vpop.permute.xlu1 %421  ;;  %v420_v3 = vpop.permute.xlu0 %419 }
  0xb0   : > { %v425_v5 = vsel %vm423_vm6, %v418_v4, %v422_v1  ;;  %v427_v52 = vsel %vm423_vm6, %v422_v1, %v418_v4  ;;  %v424_v55 = vsel %vm423_vm6, %v416_v47, %v420_v3  ;;  %v426_v56 = vsel %vm423_vm6, %v420_v3, %v416_v47  ;;  %v259_v4 = vld [vmem:[%s1897_s2 + $0x18] sm:$0xff]  ;;  %v258_v47 = vld [vmem:[%s1897_s2 + $0x10] sm:$0xff] }
  0xb1   : > { %v441_v57 = vmul.f32 %v1454_v50, %v425_v5  ;;  %v442_v58 = vmul.f32 %v1457_v51, %v427_v52  ;;  %v439_v59 = vmul.f32 %v1454_v50, %v424_v55  ;;  %v440_v60 = vmul.f32 %v1457_v51, %v426_v56 }
  0xb3   : > { %v448_v62 = vpop.permute.xlu1 %447  ;;  %v446_v63 = vpop.permute.xlu0 %445  ;;  %v1088_v6 = vpack.c.bf16 %v442_v58, %v440_v60  ;;  %v1090_v7 = vpack.c.bf16 %v441_v57, %v439_v59 }
  0xb5   : > { %1089 = vmatprep.subr.bf16.mxu0 %v1088_v6 }
  0xb6   : > { %1091 = vmatpush1.bf16.msra.mxu0 %v1090_v7 }
  0xb7   : > { %v452_v10 = vpop.permute.xlu1 %451  ;;  %v450_v11 = vpop.permute.xlu0 %449 }
  0xb8   : > { %v455_v17 = vsel %vm453_vm7, %v448_v62, %v452_v10  ;;  %v457_v18 = vsel %vm453_vm7, %v452_v10, %v448_v62  ;;  %v454_v21 = vsel %vm453_vm7, %v446_v63, %v450_v11  ;;  %v456_v22 = vsel %vm453_vm7, %v450_v11, %v446_v63 }
  0xb9   : > { %v471_v23 = vmul.f32 %v1476_v8, %v455_v17  ;;  %v472_v24 = vmul.f32 %v1479_v9, %v457_v18  ;;  %v469_v25 = vmul.f32 %v1476_v8, %v454_v21  ;;  %v470_v26 = vmul.f32 %v1479_v9, %v456_v22 }
  0xbb   : > { %v478_v28 = vpop.permute.xlu1 %477  ;;  %v476_v29 = vpop.permute.xlu0 %475  ;;  %v1092_v30 = vpack.c.bf16 %v472_v24, %v470_v26  ;;  %v1094_v31 = vpack.c.bf16 %v471_v23, %v469_v25  ;;  %v621_v23 = vld [vmem:[%s1899_s4 + $0x8] sm:$0xff]  ;;  %v822_v24 = vld [vmem:[%s1900_s5] sm:$0xff]  ;;  %v824_v26 = vld [vmem:[%s1900_s5 + $0x10] sm:$0xff] }
  0xbc   : > { %1056 = vmatprep.mubr.msk.f32.mxu1 %vm852_vm9, %v621_v23  ;;  %v823_v25 = vld [vmem:[%s1900_s5 + $0x8] sm:$0xff] }
  0xbd   : > { %1093 = vmatprep.subr.bf16.mxu0 %v1092_v30 }
  0xbe   : > { %1095 = vmatpush1.bf16.msra.mxu0 %v1094_v31 }
  0xbf   : > { %v482_v38 = vpop.permute.xlu1 %481  ;;  %v480_v39 = vpop.permute.xlu0 %479 }
  0xc0   : > { %v485_v40 = vsel %vm483_vm8, %v478_v28, %v482_v38  ;;  %v487_v41 = vsel %vm483_vm8, %v482_v38, %v478_v28  ;;  %v484_v42 = vsel %vm483_vm8, %v476_v29, %v480_v39  ;;  %v486_v43 = vsel %vm483_vm8, %v480_v39, %v476_v29  ;;  %v826_v28 = vld [vmem:[%s1900_s5 + $0x20] sm:$0xf] }
  0xc1   : > { %v501_v14 = vmul.f32 %v1498_v32, %v485_v40  ;;  %v502_v15 = vmul.f32 %v1501_v33, %v487_v41  ;;  %v499_v44 = vmul.f32 %v1498_v32, %v484_v42  ;;  %v500_v45 = vmul.f32 %v1501_v33, %v486_v43 }
  0xc3   : > { %v1096_v46 = vpack.c.bf16 %v502_v15, %v500_v45  ;;  %v1098_v0 = vpack.c.bf16 %v501_v14, %v499_v44 }
  0xc5   : > { %1097 = vmatprep.subr.bf16.mxu0 %v1096_v46 }
  0xc6   : > { %1099 = vmatpush1.bf16.msra.mxu0 %v1098_v0 }
  0xc9   : > { %596 = vmatmul.mubr.f32.vlgmr.msra.gmra.mrb[0].mxu0 %v256_v2 }
  0xca   : > { %1054 = vmatprep.mubr.msk.f32.mxu0 %vm521_vm0, %v259_v4 }
  0xcd   : > { %602 = vmatmul.mubr.f32.gmra.mrb[2].mxu0 %v258_v47 }
  0xce   : > { %1055 = vmatprep.mubr.msk.f32.mxu0 %vm521_vm0, %v261_v48 }
  0xd0   : > { %v509_v1 = vpop.permute.xlu0 %508  ;;  %v514_v61 = vpop.permute.xlu1 %513 }
  0xd1   : > { %608 = vmatmul.mubr.f32.gmra.mrb[4].mxu0 %v260_v49 }
  0xd4   : > { %v519_v11 = vpop.permute.xlu1 %518 }
 0x19c   : > { %v597_v3 = vpop.f32.mrb[0].mxu0 }
 0x19d   : > { %v598_v5 = vadd.f32 %v597_v3, %v509_v1  ;;  %v599_v52 = vpop.f32.mrb[1].mxu0 }
 0x19e   : > { %v600_v55 = vadd.f32 %v599_v52, %v509_v1 }
 0x19f   : > { %v1532_v56 = vmax.f32 %v598_v5, 0.0 }
 0x1a0   : > { %v1534_v57 = vmax.f32 %v600_v55, 0.0  ;;  %v603_v58 = vpop.f32.mrb[2].mxu0 }
 0x1a1   : > { %v605_v59 = vpop.f32.mrb[3].mxu0  ;;  %630 = vrot.lane.b32.xlu0 %v1532_v56, %s1180_s27  ;;  %v604_v63 = vadd.f32 %v603_v58, %v514_v61 }
 0x1a2   : > { %660 = vrot.lane.b32.xlu1 %v1534_v57, %s1181_s28  ;;  %v606_v7 = vadd.f32 %v605_v59, %v514_v61 }
 0x1a3   : > { %v1548_v6 = vmax.f32 %v604_v63, 0.0 }
 0x1a4   : > { %v609_v60 = vpop.f32.mrb[4].mxu0  ;;  %v1558_v10 = vmax.f32 %v606_v7, 0.0 }
 0x1a5   : > { %654 = vrot.lane.b32.xlu0 %v1532_v56, %s1181_s28  ;;  %v611_v62 = vpop.f32.mrb[5].mxu0  ;;  %v610_v17 = vadd.f32 %v609_v60, %v519_v11 }
 0x1a6   : > { %708 = vrot.lane.b32.xlu1 %v1534_v57, %s1183_s30  ;;  %v612_v21 = vadd.f32 %v611_v62, %v519_v11 }
 0x1a7   : > { %v1568_v18 = vmax.f32 %v610_v17, 0.0 }
 0x1a8   : > { %v1586_v22 = vmax.f32 %v612_v21, 0.0 }
 0x1a9   : > { %678 = vrot.lane.b32.xlu0 %v1532_v56, %s1182_s29 }
 0x1aa   : > { %732 = vrot.lane.b32.xlu1 %v1534_v57, %s1184_s7 }
 0x1ad   : > { %702 = vrot.lane.b32.xlu0 %v1532_v56, %s1183_s30 }
 0x1ae   : > { %632 = vrot.lane.b32.xlu1 %v1548_v6, %s1180_s27 }
 0x1b1   : > { %726 = vrot.lane.b32.xlu0 %v1532_v56, %s1184_s7 }
 0x1b2   : > { %680 = vrot.lane.b32.xlu1 %v1548_v6, %s1182_s29 }
 0x1b5   : > { %636 = vrot.lane.b32.xlu0 %v1534_v57, %s1180_s27 }
 0x1b6   : > { %638 = vrot.lane.b32.xlu1 %v1558_v10, %s1180_s27 }
 0x1b9   : > { %684 = vrot.lane.b32.xlu0 %v1534_v57, %s1182_s29 }
 0x1ba   : > { %686 = vrot.lane.b32.xlu1 %v1558_v10, %s1182_s29 }
 0x1bd   : > { %656 = vrot.lane.b32.xlu0 %v1548_v6, %s1181_s28 }
 0x1be   : > { %658 = vrot.lane.b32.xlu1 %v1568_v18, %s1181_s28 }
 0x1c1   : > { %704 = vrot.lane.b32.xlu0 %v1548_v6, %s1183_s30 }
 0x1c2   : > { %752 = vrot.lane.b32.xlu1 %v1548_v6, %s1185_s8 }
 0x1c5   : > { %662 = vrot.lane.b32.xlu0 %v1558_v10, %s1181_s28 }
 0x1c6   : > { %706 = vrot.lane.b32.xlu1 %v1568_v18, %s1183_s30 }
 0x1c9   : > { %710 = vrot.lane.b32.xlu0 %v1558_v10, %s1183_s30 }
 0x1ca   : > { %730 = vrot.lane.b32.xlu1 %v1568_v18, %s1184_s7 }
 0x1cd   : > { %634 = vrot.lane.b32.xlu0 %v1568_v18, %s1180_s27 }
 0x1ce   : > { %640 = vrot.lane.b32.xlu1 %v1586_v22, %s1180_s27 }
 0x1d1   : > { %728 = vrot.lane.b32.xlu0 %v1548_v6, %s1184_s7 }
 0x1d2   : > { %664 = vrot.lane.b32.xlu1 %v1586_v22, %s1181_s28 }
 0x1d5   : > { %734 = vrot.lane.b32.xlu0 %v1558_v10, %s1184_s7 }
 0x1d6   : > { %758 = vrot.lane.b32.xlu1 %v1558_v10, %s1185_s8 }
 0x1d9   : > { %682 = vrot.lane.b32.xlu0 %v1568_v18, %s1182_s29 }
 0x1da   : > { %688 = vrot.lane.b32.xlu1 %v1586_v22, %s1182_s29 }
 0x1dd   : > { %750 = vrot.lane.b32.xlu0 %v1532_v56, %s1185_s8 }
 0x1de   : > { %712 = vrot.lane.b32.xlu1 %v1586_v22, %s1183_s30 }
 0x1e1   : > { %756 = vrot.lane.b32.xlu0 %v1534_v57, %s1185_s8 }
 0x1e2   : > { %780 = vrot.lane.b32.xlu1 %v1534_v57, %s1186_s9 }
 0x1e5   : > { %754 = vrot.lane.b32.xlu0 %v1568_v18, %s1185_s8 }
 0x1e6   : > { %778 = vrot.lane.b32.xlu1 %v1568_v18, %s1186_s9 }
 0x1e9   : > { %774 = vrot.lane.b32.xlu0 %v1532_v56, %s1186_s9 }
 0x1ea   : > { %736 = vrot.lane.b32.xlu1 %v1586_v22, %s1184_s7 }
 0x1ed   : > { %776 = vrot.lane.b32.xlu0 %v1548_v6, %s1186_s9 }
 0x1ee   : > { %800 = vrot.lane.b32.xlu1 %v1548_v6, %s1187_s12 }
 0x1f1   : > { %782 = vrot.lane.b32.xlu0 %v1558_v10, %s1186_s9 }
 0x1f2   : > { %760 = vrot.lane.b32.xlu1 %v1586_v22, %s1185_s8 }
 0x1f5   : > { %798 = vrot.lane.b32.xlu0 %v1532_v56, %s1187_s12 }
 0x1f6   : > { %784 = vrot.lane.b32.xlu1 %v1586_v22, %s1186_s9 }
 0x1f9   : > { %804 = vrot.lane.b32.xlu0 %v1534_v57, %s1187_s12 }
 0x1fa   : > { %806 = vrot.lane.b32.xlu1 %v1558_v10, %s1187_s12 }
 0x1fd   : > { %802 = vrot.lane.b32.xlu0 %v1568_v18, %s1187_s12 }
 0x1fe   : > { %808 = vrot.lane.b32.xlu1 %v1586_v22, %s1187_s12 }
 0x201   : > { %829 = vperm.xlu0 %1170, %v822_v24  }
 0x202   : > { %834 = vperm.xlu1 %1171, %v823_v25  }
 0x205   : > { %839 = vperm.xlu0 %1170, %v824_v26  }
 0x206   : > { %844 = vperm.xlu1 %1171, %v825_v27  }
 0x209   : > { %849 = vperm.xlu0 %1170, %v826_v28  }
 0x213   : > { %v631_v29 = vpop.permute.xlu0 %630 }
 0x214   : > { %v661_v30 = vpop.permute.xlu1 %660 }
 0x217   : > { %v655_v31 = vpop.permute.xlu0 %654 }
 0x218   : > { %v1659_v38 = vpop.permute.xlu1 %708  ;;  %v669_v11 = vsel %vm303_vm2, %v661_v30, %v655_v31  ;;  %v666_v17 = vsel %vm303_vm2, %v655_v31, %v661_v30 }
 0x219   : > { %v672_v24 = vmul.f32 %v669_v11, %v1360_v36  ;;  %v673_v28 = vmul.f32 %v666_v17, %v1363_v37 }
 0x21b   : > { %v679_v39 = vpop.permute.xlu0 %678 }
 0x21c   : > { %v1661_v40 = vpop.permute.xlu1 %732 }
 0x21f   : > { %v1663_v41 = vpop.permute.xlu0 %702 }
 0x220   : > { %v633_v42 = vpop.permute.xlu1 %632 }
 0x223   : > { %v1665_v43 = vpop.permute.xlu0 %726 }
 0x224   : > { %v681_v14 = vpop.permute.xlu1 %680 }
 0x227   : > { %v637_v15 = vpop.permute.xlu0 %636 }
 0x228   : > { %v642_v44 = vsel %vm273_vm1, %v631_v29, %v637_v15  ;;  %v645_v45 = vsel %vm273_vm1, %v637_v15, %v631_v29  ;;  %v639_v46 = vpop.permute.xlu1 %638 }
 0x229   : > { %v648_v0 = vmul.f32 %v645_v45, %v1338_v19  ;;  %v643_v2 = vsel %vm273_vm1, %v633_v42, %v639_v46  ;;  %v646_v4 = vsel %vm273_vm1, %v639_v46, %v633_v42  ;;  %v649_v47 = vmul.f32 %v642_v44, %v1341_v20 }
 0x22a   : > { %v650_v48 = vmul.f32 %v646_v4, %v1338_v19  ;;  %v651_v49 = vmul.f32 %v643_v2, %v1341_v20 }
 0x22b   : > { %v685_v1 = vpop.permute.xlu0 %684 }
 0x22c   : > { %v687_v3 = vpop.permute.xlu1 %686  ;;  %v1100_v5 = vpack.c.bf16 %v651_v49, %v649_v47  ;;  %v1102_v52 = vpack.c.bf16 %v650_v48, %v648_v0  ;;  %v690_v25 = vsel %vm333_vm3, %v679_v39, %v685_v1  ;;  %v693_v45 = vsel %vm333_vm3, %v685_v1, %v679_v39 }
 0x22d   : > { %v691_v29 = vsel %vm333_vm3, %v681_v14, %v687_v3  ;;  %v697_v46 = vmul.f32 %v690_v25, %v1385_v54 }
 0x22e   : > { %1101 = vmatprep.subr.bf16.mxu1 %v1100_v5 }
 0x22f   : > { %1103 = vmatpush1.bf16.msra.mxu1 %v1102_v52  ;;  %v657_v55 = vpop.permute.xlu0 %656 }
 0x230   : > { %v659_v58 = vpop.permute.xlu1 %658 }
 0x233   : > { %v705_v59 = vpop.permute.xlu0 %704 }
 0x234   : > { %v1679_v60 = vpop.permute.xlu1 %752 }
 0x237   : > { %v663_v61 = vpop.permute.xlu0 %662 }
 0x238   : > { %v1681_v62 = vpop.permute.xlu1 %706  ;;  %v667_v42 = vsel %vm303_vm2, %v657_v55, %v663_v61  ;;  %v670_v15 = vsel %vm303_vm2, %v663_v61, %v657_v55  ;;  %v696_v61 = vmul.f32 %v693_v45, %v1382_v53 }
 0x239   : > { %v674_v49 = vmul.f32 %v670_v15, %v1360_v36  ;;  %v675_v39 = vmul.f32 %v667_v42, %v1363_v37 }
 0x23b   : > { %v711_v63 = vpop.permute.xlu0 %710 }
 0x23c   : > { %v1683_v7 = vpop.permute.xlu1 %730 }
 0x23f   : > { %v635_v21 = vpop.permute.xlu0 %634 }
 0x240   : > { %v641_v23 = vpop.permute.xlu1 %640 }
 0x241   : > { %v644_v26 = vsel %vm273_vm1, %v635_v21, %v641_v23  ;;  %v647_v27 = vsel %vm273_vm1, %v641_v23, %v635_v21 }
 0x242   : > { %v652_v30 = vmul.f32 %v647_v27, %v1338_v19  ;;  %v653_v31 = vmul.f32 %v644_v26, %v1341_v20  ;;  %v694_v19 = vsel %vm333_vm3, %v687_v3, %v681_v14  ;;  %v699_v20 = vmul.f32 %v691_v29, %v1385_v54 }
 0x243   : > { %v1705_v44 = vpop.permute.xlu0 %728  ;;  %v698_v11 = vmul.f32 %v694_v19, %v1382_v53 }
 0x244   : > { %v665_v0 = vpop.permute.xlu1 %664  ;;  %v1104_v2 = vpack.c.bf16 %v673_v28, %v653_v31  ;;  %v1106_v4 = vpack.c.bf16 %v672_v24, %v652_v30 }
 0x245   : > { %v668_v47 = vsel %vm303_vm2, %v659_v58, %v665_v0  ;;  %v671_v48 = vsel %vm303_vm2, %v665_v0, %v659_v58  ;;  %v1112_v58 = vpack.c.bf16 %v699_v20, %v697_v46  ;;  %v1114_v25 = vpack.c.bf16 %v698_v11, %v696_v61 }
 0x246   : > { %v676_v1 = vmul.f32 %v671_v48, %v1360_v36  ;;  %v677_v5 = vmul.f32 %v668_v47, %v1363_v37  ;;  %1105 = vmatprep.subr.bf16.mxu1 %v1104_v2  ;;  %v714_v36 = vsel %vm363_vm4, %v1663_v41, %v1659_v38  ;;  %v717_v37 = vsel %vm363_vm4, %v1659_v38, %v1663_v41 }
 0x247   : > { %1107 = vmatpush1.bf16.msra.mxu1 %v1106_v4  ;;  %v735_v52 = vpop.permute.xlu0 %734  ;;  %v720_v26 = vmul.f32 %v717_v37, %v1404_v12  ;;  %v721_v27 = vmul.f32 %v714_v36, %v1407_v16  ;;  %v715_v38 = vsel %vm363_vm4, %v705_v59, %v711_v63  ;;  %v718_v41 = vsel %vm363_vm4, %v711_v63, %v705_v59 }
 0x248   : > { %v1721_v14 = vpop.permute.xlu1 %758  ;;  %v1108_v3 = vpack.c.bf16 %v677_v5, %v675_v39  ;;  %v1110_v55 = vpack.c.bf16 %v676_v1, %v674_v49  ;;  %v723_v46 = vmul.f32 %v715_v38, %v1407_v16  ;;  %v741_v63 = vsel %vm393_vm5, %v1661_v40, %v1665_v43 }
 0x249   : > { %v739_v39 = vsel %vm393_vm5, %v1705_v44, %v735_v52  ;;  %v1126_v1 = vpack.c.bf16 %v1548_v6, %v1532_v56  ;;  %v766_v56 = vsel %vm423_vm6, %v1721_v14, %v1679_v60  ;;  %v763_v36 = vsel %vm423_vm6, %v1679_v60, %v1721_v14 }
 0x24a   : > { %1109 = vmatprep.subr.bf16.mxu1 %v1108_v3  ;;  %v746_v5 = vmul.f32 %v739_v39, %v1426_v34  ;;  %v771_v37 = vmul.f32 %v766_v56, %v1457_v51  ;;  %v627_v56 = vld [vmem:[%s1899_s4 + $0x38] sm:$0xff] }
 0x24b   : > { %1111 = vmatpush1.bf16.msra.mxu1 %v1110_v55  ;;  %v683_v17 = vpop.permute.xlu0 %682 }
 0x24c   : > { %v689_v21 = vpop.permute.xlu1 %688  ;;  %1113 = vmatprep.subr.bf16.mxu1 %v1112_v58 }
 0x24d   : > { %v692_v23 = vsel %vm333_vm3, %v683_v17, %v689_v21  ;;  %v695_v24 = vsel %vm333_vm3, %v689_v21, %v683_v17 }
 0x24e   : > { %v700_v28 = vmul.f32 %v695_v24, %v1382_v53  ;;  %v701_v29 = vmul.f32 %v692_v23, %v1385_v54  ;;  %v722_v54 = vmul.f32 %v718_v41, %v1404_v12 }
 0x24f   : > { %1115 = vmatpush1.bf16.msra.mxu1 %v1114_v25  ;;  %v751_v30 = vpop.permute.xlu0 %750 }
 0x250   : > { %v713_v31 = vpop.permute.xlu1 %712  ;;  %v1116_v42 = vpack.c.bf16 %v721_v27, %v701_v29  ;;  %v1118_v15 = vpack.c.bf16 %v720_v26, %v700_v28 }
 0x251   : > { %v716_v45 = vsel %vm363_vm4, %v1681_v62, %v713_v31  ;;  %v719_v53 = vsel %vm363_vm4, %v713_v31, %v1681_v62  ;;  %v738_v62 = vsel %vm393_vm5, %v1665_v43, %v1661_v40  ;;  %v742_v40 = vsel %vm393_vm5, %v735_v52, %v1705_v44 }
 0x252   : > { %v724_v0 = vmul.f32 %v719_v53, %v1404_v12  ;;  %v725_v59 = vmul.f32 %v716_v45, %v1407_v16  ;;  %1117 = vmatprep.subr.bf16.mxu1 %v1116_v42  ;;  %v745_v12 = vmul.f32 %v741_v63, %v1429_v35  ;;  %v1124_v16 = vpack.c.bf16 %v1558_v10, %v1534_v57 }
 0x253   : > { %1119 = vmatpush1.bf16.msra.mxu1 %v1118_v15  ;;  %v757_v2 = vpop.permute.xlu0 %756  ;;  %v744_v48 = vmul.f32 %v738_v62, %v1426_v34  ;;  %v747_v61 = vmul.f32 %v742_v40, %v1429_v35 }
 0x254   : > { %v781_v4 = vpop.permute.xlu1 %780  ;;  %v1120_v19 = vpack.c.bf16 %v725_v59, %v723_v46  ;;  %v1122_v20 = vpack.c.bf16 %v724_v0, %v722_v54  ;;  %v1128_v43 = vpack.c.bf16 %v745_v12, %v1586_v22  ;;  %v765_v57 = vsel %vm423_vm6, %v757_v2, %v751_v30 }
 0x255   : > { %v1130_v55 = vpack.c.bf16 %v744_v48, %v1568_v18  ;;  %v762_v44 = vsel %vm423_vm6, %v751_v30, %v757_v2  ;;  %v769_v18 = vmul.f32 %v765_v57, %v1457_v51 }
 0x256   : > { %1121 = vmatprep.subr.bf16.mxu1 %v1120_v19  ;;  %v768_v23 = vmul.f32 %v762_v44, %v1454_v50  ;;  %v628_v44 = vld [vmem:[%s1899_s4 + $0x40] sm:$0xf] }
 0x257   : > { %1123 = vmatpush1.bf16.msra.mxu1 %v1122_v20  ;;  %v755_v47 = vpop.permute.xlu0 %754  ;;  %v1136_v24 = vpack.c.bf16 %v771_v37, %v769_v18 }
 0x258   : > { %v779_v49 = vpop.permute.xlu1 %778  ;;  %1125 = vmatprep.subr.bf16.mxu1 %v1124_v16 }
 0x25b   : > { %v775_v10 = vpop.permute.xlu0 %774  ;;  %1127 = vmatpush1.bf16.msra.mxu1 %v1126_v1 }
 0x25c   : > { %v737_v3 = vpop.permute.xlu1 %736  ;;  %1129 = vmatprep.subr.bf16.mxu1 %v1128_v43  ;;  %v789_v25 = vsel %vm453_vm7, %v781_v4, %v775_v10 }
 0x25d   : > { %v740_v6 = vsel %vm393_vm5, %v1683_v7, %v737_v3  ;;  %v743_v22 = vsel %vm393_vm5, %v737_v3, %v1683_v7  ;;  %v793_v38 = vmul.f32 %v789_v25, %v1479_v9 }
 0x25e   : > { %v748_v52 = vmul.f32 %v740_v6, %v1426_v34  ;;  %v749_v11 = vmul.f32 %v743_v22, %v1429_v35  ;;  %v770_v34 = vmul.f32 %v763_v36, %v1454_v50  ;;  %v786_v35 = vsel %vm453_vm7, %v775_v10, %v781_v4  ;;  %v626_v6 = vld [vmem:[%s1899_s4 + $0x30] sm:$0xff]  ;;  %v629_v22 = vld [vmem:[%s1899_s4 + $0x48] sm:$0xf] }
 0x25f   : > { %v777_v58 = vpop.permute.xlu0 %776  ;;  %1131 = vmatpush1.bf16.msra.mxu1 %v1130_v55  ;;  %v792_v29 = vmul.f32 %v786_v35, %v1476_v8  ;;  %v620_v55 = vld [vmem:[%s1899_s4] sm:$0xff] }
 0x260   : > { %v801_v17 = vpop.permute.xlu1 %800  ;;  %v1132_v7 = vpack.c.bf16 %v749_v11, %v747_v61  ;;  %v1134_v21 = vpack.c.bf16 %v748_v52, %v746_v5  ;;  %v1138_v28 = vpack.c.bf16 %v770_v34, %v768_v23  ;;  %v623_v61 = vld [vmem:[%s1899_s4 + $0x18] sm:$0xff] }
 0x262   : > { %1133 = vmatprep.subr.bf16.mxu1 %v1132_v7 }
 0x263   : > { %v783_v26 = vpop.permute.xlu0 %782  ;;  %1135 = vmatpush1.bf16.msra.mxu1 %v1134_v21 }
 0x264   : > { %v761_v60 = vpop.permute.xlu1 %760  ;;  %1137 = vmatprep.subr.bf16.mxu1 %v1136_v24  ;;  %v787_v31 = vsel %vm453_vm7, %v777_v58, %v783_v26  ;;  %v790_v42 = vsel %vm453_vm7, %v783_v26, %v777_v58 }
 0x265   : > { %v764_v14 = vsel %vm423_vm6, %v755_v47, %v761_v60  ;;  %v767_v27 = vsel %vm423_vm6, %v761_v60, %v755_v47 }
 0x266   : > { %v772_v41 = vmul.f32 %v764_v14, %v1454_v50  ;;  %v773_v30 = vmul.f32 %v767_v27, %v1457_v51  ;;  %v794_v50 = vmul.f32 %v787_v31, %v1476_v8  ;;  %v795_v51 = vmul.f32 %v790_v42, %v1479_v9 }
 0x267   : > { %v799_v15 = vpop.permute.xlu0 %798  ;;  %1139 = vmatpush1.bf16.msra.mxu1 %v1138_v28 }
 0x268   : > { %v785_v45 = vpop.permute.xlu1 %784  ;;  %v1140_v53 = vpack.c.bf16 %v793_v38, %v773_v30  ;;  %v1142_v54 = vpack.c.bf16 %v792_v29, %v772_v41 }
 0x269   : > { %v788_v46 = vsel %vm453_vm7, %v779_v49, %v785_v45  ;;  %v791_v0 = vsel %vm453_vm7, %v785_v45, %v779_v49 }
 0x26a   : > { %v796_v59 = vmul.f32 %v788_v46, %v1476_v8  ;;  %v797_v63 = vmul.f32 %v791_v0, %v1479_v9  ;;  %1141 = vmatprep.subr.bf16.mxu1 %v1140_v53 }
 0x26b   : > { %v805_v2 = vpop.permute.xlu0 %804  ;;  %1143 = vmatpush1.bf16.msra.mxu1 %v1142_v54 }
 0x26c   : > { %v810_v4 = vsel %vm483_vm8, %v799_v15, %v805_v2  ;;  %v813_v19 = vsel %vm483_vm8, %v805_v2, %v799_v15  ;;  %v807_v20 = vpop.permute.xlu1 %806  ;;  %v1144_v62 = vpack.c.bf16 %v797_v63, %v795_v51  ;;  %v1146_v12 = vpack.c.bf16 %v796_v59, %v794_v50 }
 0x26d   : > { %v816_v16 = vmul.f32 %v810_v4, %v1498_v32  ;;  %v817_v47 = vmul.f32 %v813_v19, %v1501_v33  ;;  %v811_v8 = vsel %vm483_vm8, %v801_v17, %v807_v20  ;;  %v814_v9 = vsel %vm483_vm8, %v807_v20, %v801_v17 }
 0x26e   : > { %v818_v48 = vmul.f32 %v811_v8, %v1498_v32  ;;  %v819_v49 = vmul.f32 %v814_v9, %v1501_v33  ;;  %1145 = vmatprep.subr.bf16.mxu1 %v1144_v62 }
 0x26f   : > { %v803_v39 = vpop.permute.xlu0 %802  ;;  %1147 = vmatpush1.bf16.msra.mxu1 %v1146_v12 }
 0x270   : > { %v809_v1 = vpop.permute.xlu1 %808  ;;  %v1148_v40 = vpack.c.bf16 %v819_v49, %v817_v47  ;;  %v1150_v43 = vpack.c.bf16 %v818_v48, %v816_v16 }
 0x271   : > { %v815_v57 = vsel %vm483_vm8, %v809_v1, %v803_v39  ;;  %v812_v10 = vsel %vm483_vm8, %v803_v39, %v809_v1 }
 0x272   : > { %v821_v5 = vmul.f32 %v815_v57, %v1501_v33  ;;  %1149 = vmatprep.subr.bf16.mxu1 %v1148_v40  ;;  %v820_v3 = vmul.f32 %v812_v10, %v1498_v32  ;;  %v625_v32 = vld [vmem:[%s1899_s4 + $0x28] sm:$0xff]  ;;  %v624_v33 = vld [vmem:[%s1899_s4 + $0x20] sm:$0xff] }
 0x273   : > { %1151 = vmatpush1.bf16.msra.mxu1 %v1150_v43 }
 0x274   : > { %920 = vmatprep.subr.mxu1 %v821_v5 }
 0x277   : > { %921 = vmatpush1.msra.mxu1 %v820_v3 }
 0x278   : > { %933 = vmatmul.mubr.f32.vlgmr.msra.gmra.mrb[0].mxu1 %v620_v55 }
 0x279   : > { %1057 = vmatprep.mubr.msk.f32.mxu1 %vm852_vm9, %v623_v61 }
 0x27c   : > { %939 = vmatmul.mubr.f32.gmra.mrb[2].mxu1 %v622_v13 }
 0x27d   : > { %1058 = vmatprep.mubr.msk.f32.mxu1 %vm852_vm9, %v625_v32 }
 0x280   : > { %945 = vmatmul.mubr.f32.gmra.mrb[4].mxu1 %v624_v33  ;;  %v830_v18 = vpop.permute.xlu0 %829 }
 0x281   : > { %1059 = vmatprep.mubr.msk.f32.mxu1 %vm852_vm9, %v627_v56  ;;  %v835_v17 = vpop.permute.xlu1 %834 }
 0x284   : > { %951 = vmatmul.mubr.f32.gmra.mrb[6].mxu1 %v626_v6  ;;  %v840_v25 = vpop.permute.xlu0 %839 }
 0x285   : > { %1060 = vmatprep.mubr.msk.f32.mxu1 %vm852_vm9, %v629_v22  ;;  %v845_v38 = vpop.permute.xlu1 %844 }
 0x288   : > { %957 = vmatmul.mubr.f32.gmra.mrb[8].mxu1 %v628_v44  ;;  %v850_v53 = vpop.permute.xlu0 %849 }
 0x34b   : > { %v934_v52 = vpop.f32.mrb[0].mxu1 }
 0x34c   : > { %v935_v11 = vadd.f32 %v934_v52, %v830_v18  ;;  %v936_v58 = vpop.f32.mrb[1].mxu1 }
 0x34d   : > { %v937_v36 = vadd.f32 %v936_v58, %v830_v18 }
 0x34e   : > { %v963_v37 = vmax.f32 %v935_v11, 0.0 }
 0x34f   : > { %v964_v7 = vmax.f32 %v937_v36, 0.0  ;;  %v940_v21 = vpop.f32.mrb[2].mxu1 }
 0x350   : > { %973 = vst [vmem:[%s1880_s20] sm:$0xff] %v963_v37  ;;  %v941_v23 = vadd.f32 %v940_v21, %v835_v17  ;;  %v942_v24 = vpop.f32.mrb[3].mxu1 }
 0x351   : > { %974 = vst [vmem:[%s1880_s20 + $0x8] sm:$0xff] %v964_v7  ;;  %v943_v34 = vadd.f32 %v942_v24, %v835_v17 }
 0x352   : > { %v965_v35 = vmax.f32 %v941_v23, 0.0 }
 0x353   : > { %v966_v26 = vmax.f32 %v943_v34, 0.0  ;;  %v946_v60 = vpop.f32.mrb[4].mxu1 }
 0x354   : > { %975 = vst [vmem:[%s1880_s20 + $0x10] sm:$0xff] %v965_v35  ;;  %v947_v14 = vadd.f32 %v946_v60, %v840_v25  ;;  %v948_v27 = vpop.f32.mrb[5].mxu1 }
 0x355   : > { %976 = vst [vmem:[%s1880_s20 + $0x18] sm:$0xff] %v966_v26  ;;  %v949_v28 = vadd.f32 %v948_v27, %v840_v25 }
 0x356   : > { %v967_v29 = vmax.f32 %v947_v14, 0.0 }
 0x357   : > { %v968_v41 = vmax.f32 %v949_v28, 0.0  ;;  %v952_v30 = vpop.f32.mrb[6].mxu1 }
 0x358   : > { %977 = vst [vmem:[%s1880_s20 + $0x20] sm:$0xff] %v967_v29  ;;  %v953_v31 = vadd.f32 %v952_v30, %v845_v38  ;;  %v954_v42 = vpop.f32.mrb[7].mxu1 }
 0x359   : > { %978 = vst [vmem:[%s1880_s20 + $0x28] sm:$0xff] %v968_v41  ;;  %v955_v15 = vadd.f32 %v954_v42, %v845_v38 }
 0x35a   : > { %v969_v45 = vmax.f32 %v953_v31, 0.0 }
 0x35b   : > { %v970_v54 = vmax.f32 %v955_v15, 0.0  ;;  %v958_v46 = vpop.f32.mrb[8].mxu1 }
 0x35c   : > { %979 = vst [vmem:[%s1880_s20 + $0x30] sm:$0xff] %v969_v45  ;;  %v959_v0 = vadd.f32 %v958_v46, %v850_v53  ;;  %v960_v50 = vpop.f32.mrb[9].mxu1 }
 0x35d   : > { %980 = vst [vmem:[%s1880_s20 + $0x38] sm:$0xff] %v970_v54  ;;  %v961_v51 = vadd.f32 %v960_v50, %v850_v53 }
 0x35e   : > { %v971_v59 = vmax.f32 %v959_v0, 0.0 }
 0x35f   : > { %v972_v63 = vmax.f32 %v961_v51, 0.0 }
 0x360   : > { %981 = vst [vmem:[%s1880_s20 + $0x40] sm:$0xf] %v971_v59 }
 0x361   : > { %982 = vst [vmem:[%s1880_s20 + $0x48] sm:$0xf] %v972_v63 }
 0x362 PF: > { %s16_s21 = sadd.s32 1, %s1178_s21  }
 0x363   : > { %p13_p4 = scmp.ge.s32.totalorder %s16_s21, 4  }
 0x365   :  { %15 = sbr.rel (!%p13_p4) target bundleno = 1 (0x1), region = 81 }

</bundles_post_ra>
